<compile_context>
chip_gen: v7x
topology: tpu7x:2x2x1
jax: 0.10.0
libtpu: 0.0.40
codegen_flags: <defaults>
</compile_context>

<pallas_src>
import jax
import jax.numpy as jnp
from jax.experimental import pallas as pl
from jax.experimental.pallas import tpu as pltpu

LANES = 128
_TARGET_BLOCK_BYTES = 2 * 1024 * 1024   # per-operand VMEM block (~2 MiB)
_MIN_GRID_STEPS = 4                     # >= 2 steps per TC on v7x (2 TCs) + pipelining
_VMEM_LIMIT_BYTES = 32 * 1024 * 1024    # explicit scoped-VMEM budget, safe on v5e/v6e/v7x


def _hist_activation_kernel(x_ref, o_ref):
    # sigmoid'(x) = s*(1-s) = 0.25 * (1 - tanh(x/2)^2)
    # tanh lowers to the EUP (its own bundle slot); the rest are cheap VPU ops.
    x = x_ref[...]
    if x.dtype != jnp.bfloat16:
        # f32 (and any integer input) computes in f32; bf16 stays native.
        x = x.astype(jnp.float32)
    t = jnp.tanh(x * 0.5)
    o_ref[...] = (0.25 - (t * t) * 0.25).astype(o_ref.dtype)


def _sigmoid_derivative_jnp(x, out_dtype):
    # Same formula as the kernel; used only for the (<128-element) ragged tail.
    xc = x if x.dtype == jnp.bfloat16 else x.astype(jnp.float32)
    t = jnp.tanh(xc * 0.5)
    return (0.25 - (t * t) * 0.25).astype(out_dtype)


def _pick_width(m):
    """Largest lane-dense width that divides m (m is a multiple of 128)."""
    for cand in (4096, 2048, 1024, 512, 256, 128):
        if m % cand == 0:
            return cand
    return 0


def _hist_activation_pallas(x_flat, out_dtype):
    """x_flat: 1-D array whose length is a multiple of 128."""
    n = x_flat.size
    in_itemsize = jnp.dtype(x_flat.dtype).itemsize
    out_itemsize = jnp.dtype(out_dtype).itemsize

    width = _pick_width(n)
    rows = n // width
    # Contiguous row-major reshape -> bitcast, no HBM traffic.
    x2d = jnp.reshape(x_flat, (rows, width))

    # dtype-aware sublane alignment: 8 (f32), 16 (bf16/f16), 32 (int8/fp8).
    sublane = max(8, 32 // max(in_itemsize, 1))

    if rows <= sublane:
        block_rows = rows  # single block; block dim == full array dim (always legal)
    else:
        # Cap at ~_TARGET_BLOCK_BYTES per operand ...
        cap = _TARGET_BLOCK_BYTES // (width * in_itemsize)
        cap = max(sublane, (cap // sublane) * sublane)
        # ... but also small enough that the grid has >= _MIN_GRID_STEPS steps.
        split = -(-rows // _MIN_GRID_STEPS)
        split = max(sublane, (split // sublane) * sublane)
        block_rows = min(cap, split)

    # Ragged last row-block (if block_rows doesn't divide rows) is handled by
    # Pallas partial-block masking; raggedness never reaches the lane dim.
    grid = (pl.cdiv(rows, block_rows),)

    out2d = pl.pallas_call(
        _hist_activation_kernel,
        out_shape=jax.ShapeDtypeStruct((rows, width), out_dtype),
        grid_spec=pltpu.PrefetchScalarGridSpec(
            num_scalar_prefetch=0,
            grid=grid,
            in_specs=[pl.BlockSpec((block_rows, width), lambda i: (i, 0))],
            out_specs=pl.BlockSpec((block_rows, width), lambda i: (i, 0)),
        ),
        compiler_params=pltpu.CompilerParams(
            # row-blocks shard across both v7x TensorCores
            dimension_semantics=("parallel",),
            vmem_limit_bytes=_VMEM_LIMIT_BYTES,
        ),
        cost_estimate=pl.CostEstimate(
            flops=4 * n,
            transcendentals=n,
            bytes_accessed=n * (in_itemsize + out_itemsize),
        ),
    )(x2d)
    return jnp.reshape(out2d, (-1,))


def hist_activation(x):
    """Elementwise sigmoid-derivative (HistActivation.forward) via a Pallas TPU kernel."""
    orig_shape = x.shape
    out_dtype = x.dtype if jnp.issubdtype(x.dtype, jnp.floating) else jnp.float32
    n = x.size
    if n == 0:
        return jnp.zeros(orig_shape, out_dtype)

    x_flat = jnp.reshape(x, (-1,))  # contiguous -> bitcast

    # Lane-aligned prefix goes through Pallas; the tiny (<128 element) ragged
    # tail, if any, is finished with plain jnp.  No whole-array pad/slice passes.
    main_n = (n // LANES) * LANES
    tail_n = n - main_n

    pieces = []
    if main_n:
        main_in = x_flat[:main_n] if tail_n else x_flat
        pieces.append(_hist_activation_pallas(main_in, out_dtype))
    if tail_n:
        pieces.append(_sigmoid_derivative_jnp(x_flat[main_n:], out_dtype))

    out_flat = pieces[0] if len(pieces) == 1 else jnp.concatenate(pieces)
    return jnp.reshape(out_flat, orig_shape)


def _ref(x):
    s = jax.nn.sigmoid(x.astype(jnp.float32))
    return s * (1.0 - s)


if __name__ == "__main__":
    key = jax.random.PRNGKey(0)
    k0, k1, k2 = jax.random.split(key, 3)

    # 1) NCHW-style input matching the UNet module (aligned fast path).
    x = jax.random.normal(k0, (2, 4, 16, 16), dtype=jnp.float32)
    y = jax.block_until_ready(hist_activation(x))
    assert y.shape == x.shape and y.dtype == x.dtype
    assert jnp.allclose(y, _ref(x).astype(x.dtype), atol=2e-6, rtol=1e-5), float(
        jnp.max(jnp.abs(y - _ref(x)))
    )

    # 2) Non-128-aligned shape (prefix kernel + jnp tail path).
    xu = jax.random.normal(k1, (3, 5, 41), dtype=jnp.float32) * 4.0
    yu = jax.block_until_ready(hist_activation(xu))
    assert yu.shape == xu.shape and yu.dtype == xu.dtype
    assert jnp.allclose(yu, _ref(xu).astype(xu.dtype), atol=2e-6, rtol=1e-5)

    # 3) bf16 input (native bf16 compute path).
    xb = jax.random.normal(k2, (8, 32, 64), dtype=jnp.bfloat16)
    yb = jax.block_until_ready(hist_activation(xb))
    assert yb.shape == xb.shape and yb.dtype == xb.dtype
    assert jnp.allclose(
        yb.astype(jnp.float32), _ref(xb), atol=5e-3, rtol=5e-2
    ), float(jnp.max(jnp.abs(yb.astype(jnp.float32) - _ref(xb))))

    print("KERNEL_OK")
</pallas_src>

<mosaic_0001>
module attributes {stable_mosaic.version = 11 : i64} {
  func.func @_hist_activation_kernel(%arg0: i32, %arg1: memref<1x2048xf32, #tpu.memory_space<vmem>>, %arg2: memref<1x2048xf32, #tpu.memory_space<vmem>>) attributes {dimension_semantics = [#tpu.dimension_semantics<parallel>], iteration_bounds = array<i64: 1>, scalar_prefetch = 0 : i64, scratch_operands = 0 : i64, tpu.core_type = #tpu.core_type<tc>, window_params = [{transform_indices = @transform_0, window_bounds = array<i64: 1, 2048>}, {transform_indices = @transform_1, window_bounds = array<i64: 1, 2048>}]} {
    %c0 = arith.constant 0 : index
    %c0_0 = arith.constant 0 : index
    %0 = vector.load %arg1[%c0, %c0_0] : memref<1x2048xf32, #tpu.memory_space<vmem>>, vector<1x2048xf32>
    %cst = arith.constant 5.000000e-01 : f32
    %1 = vector.broadcast %cst : f32 to vector<1x2048xf32>
    %2 = arith.mulf %0, %1 : vector<1x2048xf32>
    %3 = math.tanh %2 : vector<1x2048xf32>
    %4 = arith.mulf %3, %3 : vector<1x2048xf32>
    %cst_1 = arith.constant 2.500000e-01 : f32
    %5 = vector.broadcast %cst_1 : f32 to vector<1x2048xf32>
    %6 = arith.mulf %4, %5 : vector<1x2048xf32>
    %cst_2 = arith.constant 2.500000e-01 : f32
    %7 = vector.broadcast %cst_2 : f32 to vector<1x2048xf32>
    %8 = arith.subf %7, %6 : vector<1x2048xf32>
    %c0_3 = arith.constant 0 : index
    %c0_4 = arith.constant 0 : index
    %9 = vector.load %arg2[%c0_3, %c0_4] : memref<1x2048xf32, #tpu.memory_space<vmem>>, vector<1x2048xf32>
    tpu.vector_store %arg2[%c0_3, %c0_4], %8 {strides = array<i32>} : memref<1x2048xf32, #tpu.memory_space<vmem>>, vector<1x2048xf32>,
    return
  }
  func.func @transform_0(%arg0: i32) -> (i32, i32) {
    %c0_i32 = arith.constant 0 : i32
    %c0_i32_0 = arith.constant 0 : i32
    return %arg0, %c0_i32 : i32, i32
  }
  func.func @transform_1(%arg0: i32) -> (i32, i32) {
    %c0_i32 = arith.constant 0 : i32
    %c0_i32_0 = arith.constant 0 : i32
    return %arg0, %c0_i32 : i32, i32
  }
}

</mosaic_0001>

<bundles_post_ra>
// kernel: tpu_custom_call.1
= control target key start
LH: loop header
LB: loop body
LE: loop exit
PB: predicated region body
PF: predicated region fallthrough
CT: control target
= control target key end

     0   :  { %6 = vsyncpa [#allocation3], 0  ;;  %s140_s0 = inlined_call_operand.hbm [shape: f32[1,2048], index: 0, kind: input, shape index: {}]   ;;  %s141_s1 = inlined_call_operand.hbm [shape: f32[1,2048], index: 1, kind: output, shape index: {}]  }
   0x1   :  { %7 = vsyncpa [#allocation4], 0  ;;  %s104_s6 = smov [#allocation2]   ;;  %s56_s10 = scalar_lea.hbm %s140_s0, 256 }
   0x2   :  { %s14_s7 = sshll.u32 %s104_s6, 4  ;;  %p57_p0 = scmp.ne.s32.totalorder %s140_s0, %s56_s10  ;;  %s15_s7 = int_to_ptr.vmem [resolvable:$true] %s14_s7 }
   0x3   :  { %p60_p1 = scmp.lt.u32.totalorder %s56_s10, %s140_s0 }
   0x5   :  { %p62_p2 = pnand %p60_p1, %p57_p0 }
   0x7   :  { %65 = shalt.err (!%p62_p2)
}
   0x8   :  { %s66_s15 = scalar_lea.vmem %s15_s7, 256  ;;  %p71_p4 = scmp.lt.s32.totalorder %s15_s7, %s15_s7 }
   0x9   :  { %p67_p3 = scmp.ne.s32.totalorder %s15_s7, %s66_s15  ;;  %p72_p5 = scmp.lt.s32.totalorder %s66_s15, %s66_s15 }
   0xb   :  { %p73_p6 = por %p72_p5, %p71_p4 }
   0xd   :  { %p74_p7 = pnand %p73_p6, %p67_p3 }
   0xf   :  { %77 = shalt.err (!%p74_p7)
}
  0x10   :  { %17 = dma.hbm_to_vmem [thread:$0]  %s140_s0, 256, %s15_s7, [#allocation3]  }
  0x11   :  { %100 = dma.done.wait [#allocation3], 256  }
  0x12   :  { %101 = vsyncadd [#allocation3], 4294967040  ;;  %v21_v0 = vld [vmem:[#allocation2] sm:$0xff]  ;;  %v22_v1 = vld [vmem:[#allocation2 + $0x8] sm:$0xff]  ;;  %s105_s18 = smov [#allocation5]  }
  0x13   :  { %v23_v2 = vmul.f32 0.5, %v21_v0  ;;  %v24_v3 = vmul.f32 0.5, %v22_v1  ;;  %s41_s19 = sshll.u32 %s105_s18, 4  ;;  %s42_s19 = int_to_ptr.vmem [resolvable:$true] %s41_s19 }
  0x14   :  { %s78_s0 = scalar_lea.vmem %s42_s19, 256  ;;  %p83_p9 = scmp.lt.s32.totalorder %s42_s19, %s42_s19 }
  0x15   :  { %52 = vtanh.f32 %v23_v2  ;;  %p79_p8 = scmp.ne.s32.totalorder %s42_s19, %s78_s0  ;;  %p84_p10 = scmp.lt.s32.totalorder %s78_s0, %s78_s0 }
  0x16   :  { %54 = vtanh.f32 %v24_v3 }
  0x17   :  { %p85_p11 = por %p84_p10, %p83_p9 }
  0x19   :  { %p86_p12 = pnand %p85_p11, %p79_p8 }
  0x1f   :  { %v53_v4 = vpop.eup %52 }
  0x20   :  { %v55_v5 = vpop.eup %54  ;;  %v27_v6 = vmul.f32 %v53_v4, %v53_v4 }
  0x21   :  { %v28_v7 = vmul.f32 %v55_v5, %v55_v5 }
  0x22   :  { %v29_v8 = vmul.f32 0.25, %v27_v6 }
  0x23   :  { %v30_v9 = vmul.f32 0.25, %v28_v7 }
  0x24   :  { %v31_v10 = vsub.f32 0.25, %v29_v8 }
  0x25   :  { %v32_v11 = vsub.f32 0.25, %v30_v9 }
  0x26   :  { %33 = vst [vmem:[#allocation5] sm:$0xff] %v31_v10 }
  0x27   :  { %34 = vst [vmem:[#allocation5 + $0x8] sm:$0xff] %v32_v11 }
  0x28   :  { %89 = shalt.err (!%p86_p12)
}
  0x29   :  { %s90_s22 = scalar_lea.hbm %s141_s1, 256 }
  0x2a   :  { %p91_p13 = scmp.ne.s32.totalorder %s141_s1, %s90_s22  ;;  %p94_p0 = scmp.lt.u32.totalorder %s90_s22, %s141_s1 }
  0x2c   :  { %p96_p1 = pnand %p94_p0, %p91_p13 }
  0x2e   :  { %99 = shalt.err (!%p96_p1)
}
  0x2f   :  { %44 = dma.vmem_to_hbm [thread:$0]  %s42_s19, 256, %s141_s1, [#allocation4]  }
  0x30   :  { %102 = dma.done.wait [#allocation4], 256  }
  0x31   :  { %103 = vsyncadd [#allocation4], 4294967040 }
  0x32   :  { %48 = vsyncpa [#allocation3], 1 }
  0x33   :  { %49 = vsyncpa [#allocation4], 1 }

</bundles_post_ra>
